<compile_context>
chip_gen: v7x
topology: tpu7x:2x2x1
jax: 0.10.0
libtpu: 0.0.40
codegen_flags: <defaults>
</compile_context>

<pallas_src>
import functools
import math

import jax
import jax.numpy as jnp
from jax.experimental import pallas as pl
from jax.experimental.pallas import tpu as pltpu


def _round_up(x, m):
    return ((x + m - 1) // m) * m


# ----------------------------- Pallas kernel --------------------------------
def _gather_kernel(idx_ref, w_ref, o_ref, acc_ref, *, tv):
    """Embedding gather expressed as (in-register one-hot) @ (weight block).

    idx_ref: (TM, 1) int32  row indices for this row tile (VMEM)
    w_ref:   (TV, TH) f32   current vocab/hidden block of the table
    o_ref:   (TM, TH) f32   output block (written on the last vocab step)
    acc_ref: (TM, TH) f32   VMEM accumulator over the vocab reduction axis
    """
    v = pl.program_id(2)  # vocab (reduction) axis, innermost

    @pl.when(v == 0)
    def _init():
        acc_ref[...] = jnp.zeros_like(acc_ref)

    ids = idx_ref[...]                       # (TM, 1) int32
    local = ids - v * tv                     # index relative to this vocab block
    tm = ids.shape[0]
    # Rebuild the one-hot tile in-register (VPU iota + compare): rows whose
    # index falls outside [v*tv, (v+1)*tv) match nothing and contribute 0.
    hot = (jax.lax.broadcasted_iota(jnp.int32, (tm, tv), 1) == local)
    hot = hot.astype(jnp.float32)
    # f32 x f32 MXU matmul selects the weight rows exactly (one-hot is 0/1).
    acc_ref[...] += jnp.dot(hot, w_ref[...], preferred_element_type=jnp.float32)

    @pl.when(v == pl.num_programs(2) - 1)
    def _finalize():
        o_ref[...] = acc_ref[...].astype(o_ref.dtype)


# ------------------------------ kernel wrapper -------------------------------
@functools.partial(jax.jit, static_argnames=("tm", "th", "tv"))
def embedding_gather(idx, weight, *, tm=512, th=512, tv=4096):
    """dense[..., :] = weight[idx[...], :] computed inside a Pallas TPU kernel.

    idx:    int32 [...], values in [0, V)
    weight: f32 [V, H] embedding table
    return: f32 [..., H]
    """
    orig_shape = idx.shape
    M = int(math.prod(orig_shape)) if orig_shape else 1
    V, H = weight.shape

    # Tile sizes: multiples of (8, 128) (or full dims for tiny demo shapes).
    TM = min(tm, _round_up(M, 8))
    TH = min(th, _round_up(H, 128))
    TV = min(tv, _round_up(V, 8))

    M_pad = _round_up(M, TM)
    H_pad = _round_up(_round_up(H, 128), TH)
    V_pad = _round_up(V, TV)

    idx_flat = idx.reshape(M).astype(jnp.int32)
    idx_pad = jnp.pad(idx_flat, (0, M_pad - M)).reshape(M_pad, 1)
    w_pad = jnp.pad(weight.astype(jnp.float32),
                    ((0, V_pad - V), (0, H_pad - H)))

    grid = (H_pad // TH, M_pad // TM, V_pad // TV)

    # Explicit scoped-VMEM budget: double-buffered weight / index / output
    # blocks plus the accumulator, with headroom. Floor at 32 MiB, cap below
    # v7x's 64 MiB physical VMEM.
    vmem_need = (2 * (TV * TH * 4) + 2 * (TM * 1 * 4)
                 + 2 * (TM * TH * 4) + TM * TH * 4)
    vmem_limit = min(max(2 * vmem_need + (4 << 20), 32 << 20), 48 << 20)

    out_pad = pl.pallas_call(
        functools.partial(_gather_kernel, tv=TV),
        out_shape=jax.ShapeDtypeStruct((M_pad, H_pad), jnp.float32),
        grid_spec=pltpu.PrefetchScalarGridSpec(
            num_scalar_prefetch=0,
            grid=grid,
            in_specs=[
                # tiny int32 index column per row tile
                pl.BlockSpec((TM, 1), lambda h, r, v: (r, 0)),
                # weight block: constant across the inner row axis -> fetched
                # once per (h, v), not per row tile
                pl.BlockSpec((TV, TH), lambda h, r, v: (v, h)),
            ],
            out_specs=pl.BlockSpec((TM, TH), lambda h, r, v: (r, h)),
            scratch_shapes=[pltpu.VMEM((TM, TH), jnp.float32)],
        ),
        compiler_params=pltpu.CompilerParams(
            dimension_semantics=("parallel", "parallel", "arbitrary"),
            vmem_limit_bytes=vmem_limit,
        ),
        cost_estimate=pl.CostEstimate(
            flops=2 * M_pad * V_pad * H_pad,
            transcendentals=0,
            bytes_accessed=(M_pad * 4 + V_pad * H_pad * 4 + M_pad * H_pad * 4),
        ),
    )(idx_pad, w_pad)

    return out_pad[:M, :H].reshape(*orig_shape, H)


def onehot_embed(x_onehot, weight, **tile_kw):
    """dense = one_hot @ weight.

    Per the spEncoder contract the input rows are exactly one-hot, so the
    matmul is equivalent to a row gather; recover the indices and gather
    inside the Pallas kernel (removes the V factor from kernel HBM traffic).
    """
    idx = jnp.argmax(x_onehot, axis=-1).astype(jnp.int32)
    return embedding_gather(idx, weight, **tile_kw)


# --------------------------- module equivalent -------------------------------
class SpEncoderPallas:
    """Concrete spEncoder: each pipeline is a one-hot -> dense embedding lookup."""

    def __init__(self, arg):
        if not isinstance(arg, dict):
            arg = vars(arg)
        self.pipeline_dict = None
        self.input_mapping = None
        self.build_pipelines(arg)

    def build_pipelines(self, arg):
        hidden = arg["hidden"]
        key = jax.random.PRNGKey(arg.get("seed", 0))
        self.weights = {}
        self.pipeline_dict = {}
        self.input_mapping = {}
        for name in sorted(arg["vocabs"].keys()):
            vocab = arg["vocabs"][name]
            key, wkey = jax.random.split(key)
            # deterministic synthetic embedding table (no checkpoint load)
            w = jax.random.normal(wkey, (vocab, hidden), dtype=jnp.float32) * 0.02
            self.weights[name] = w
            self.pipeline_dict[name] = functools.partial(onehot_embed, weight=w)
            self.input_mapping[name] = name + "_onehot"

    def forward(self, x):
        output_dict = {}
        for k, v in self.pipeline_dict.items():
            output_dict[k] = v(x[self.input_mapping[k]])
        return output_dict

    __call__ = forward


# --------------------------------- demo --------------------------------------
if __name__ == "__main__":
    B, S, H = 2, 8, 32
    vocabs = {"word": 32, "char": 16}

    enc = SpEncoderPallas({"hidden": H, "vocabs": vocabs, "seed": 0})

    key = jax.random.PRNGKey(0)
    x = {}
    for name, V in vocabs.items():
        key, ik = jax.random.split(key)
        idx = jax.random.randint(ik, (B, S), 0, V)
        x[name + "_onehot"] = jax.nn.one_hot(idx, V, dtype=jnp.float32)

    out = enc(x)
    out = jax.tree_util.tree_map(jax.block_until_ready, out)

    # correctness check against plain-JAX reference (embedding gather)
    ok = True
    for name, V in vocabs.items():
        idx = jnp.argmax(x[name + "_onehot"], axis=-1)
        ref = enc.weights[name][idx]
        ok &= out[name].shape == (B, S, H)
        # tolerance covers a worst-case single-pass bf16 MXU decomposition of
        # the f32 matmul; the gather itself is exact.
        ok &= bool(jnp.allclose(out[name], ref, atol=1e-3, rtol=1e-3))

    if ok:
        print("KERNEL_OK")
</pallas_src>

<mosaic_0001>
module attributes {stable_mosaic.version = 11 : i64} {
  func.func @_gather_kernel(%arg0: i32, %arg1: i32, %arg2: i32, %arg3: memref<16x1xi32, #tpu.memory_space<vmem>>, %arg4: memref<16x128xf32, #tpu.memory_space<vmem>>, %arg5: memref<16x128xf32, #tpu.memory_space<vmem>>, %arg6: memref<16x128xf32, #tpu.memory_space<vmem>>) attributes {dimension_semantics = [#tpu.dimension_semantics<parallel>, #tpu.dimension_semantics<parallel>, #tpu.dimension_semantics<arbitrary>], iteration_bounds = array<i64: 1, 1, 1>, scalar_prefetch = 0 : i64, scratch_operands = 1 : i64, tpu.core_type = #tpu.core_type<tc>, window_params = [{transform_indices = @transform_0, window_bounds = array<i64: 16, 1>}, {transform_indices = @transform_1, window_bounds = array<i64: 16, 128>}, {transform_indices = @transform_2, window_bounds = array<i64: 16, 128>}]} {
    %c0_i32 = arith.constant 0 : i32
    %0 = arith.cmpi eq, %arg2, %c0_i32 : i32
    %1 = arith.extui %0 : i1 to i32
    %c0_i32_0 = arith.constant 0 : i32
    %2 = arith.cmpi ne, %1, %c0_i32_0 : i32
    scf.if %2 {
      %cst_10 = arith.constant 0.000000e+00 : f32
      %20 = vector.broadcast %cst_10 : f32 to vector<16x128xf32>
      %c0_11 = arith.constant 0 : index
      %c0_12 = arith.constant 0 : index
      %21 = vector.load %arg6[%c0_11, %c0_12] : memref<16x128xf32, #tpu.memory_space<vmem>>, vector<16x128xf32>
      tpu.vector_store %arg6[%c0_11, %c0_12], %20 {strides = array<i32>} : memref<16x128xf32, #tpu.memory_space<vmem>>, vector<16x128xf32>,
    } else {
    }
    %c0 = arith.constant 0 : index
    %c0_1 = arith.constant 0 : index
    %3 = vector.load %arg3[%c0, %c0_1] : memref<16x1xi32, #tpu.memory_space<vmem>>, vector<16x1xi32>
    %c16_i32 = arith.constant 16 : i32
    %4 = arith.muli %arg2, %c16_i32 : i32
    %5 = vector.broadcast %4 : i32 to vector<16x1xi32>
    %6 = arith.subi %3, %5 : vector<16x1xi32>
    %7 = tpu.iota {dimensions = array<i32: 1>} : vector<16x16xi32>
    %8 = vector.broadcast %6 : vector<16x1xi32> to vector<16x16xi32>
    %9 = arith.cmpi eq, %7, %8 : vector<16x16xi32>
    %10 = arith.extui %9 : vector<16x16xi1> to vector<16x16xi32>
    %11 = arith.sitofp %10 : vector<16x16xi32> to vector<16x16xf32>
    %c0_2 = arith.constant 0 : index
    %c0_3 = arith.constant 0 : index
    %12 = vector.load %arg6[%c0_2, %c0_3] : memref<16x128xf32, #tpu.memory_space<vmem>>, vector<16x128xf32>
    %c0_4 = arith.constant 0 : index
    %c0_5 = arith.constant 0 : index
    %13 = vector.load %arg4[%c0_4, %c0_5] : memref<16x128xf32, #tpu.memory_space<vmem>>, vector<16x128xf32>
    %cst = arith.constant dense<0.000000e+00> : vector<16x128xf32>
    %14 = tpu.matmul %11, %13, %cst {dimension_numbers = #tpu.dot_dimension_numbers<[1], [0], [0], [1], [0, 0, 1, 1], [], []>} : vector<16x16xf32>, vector<16x128xf32>, vector<16x128xf32> -> vector<16x128xf32>
    %15 = arith.addf %12, %14 : vector<16x128xf32>
    %c0_6 = arith.constant 0 : index
    %c0_7 = arith.constant 0 : index
    %16 = vector.load %arg6[%c0_6, %c0_7] : memref<16x128xf32, #tpu.memory_space<vmem>>, vector<16x128xf32>
    tpu.vector_store %arg6[%c0_6, %c0_7], %15 {strides = array<i32>} : memref<16x128xf32, #tpu.memory_space<vmem>>, vector<16x128xf32>,
    %c0_i32_8 = arith.constant 0 : i32
    %17 = arith.cmpi eq, %arg2, %c0_i32_8 : i32
    %18 = arith.extui %17 : i1 to i32
    %c0_i32_9 = arith.constant 0 : i32
    %19 = arith.cmpi ne, %18, %c0_i32_9 : i32
    scf.if %19 {
      %c0_10 = arith.constant 0 : index
      %c0_11 = arith.constant 0 : index
      %20 = vector.load %arg6[%c0_10, %c0_11] : memref<16x128xf32, #tpu.memory_space<vmem>>, vector<16x128xf32>
      %c0_12 = arith.constant 0 : index
      %c0_13 = arith.constant 0 : index
      %21 = vector.load %arg5[%c0_12, %c0_13] : memref<16x128xf32, #tpu.memory_space<vmem>>, vector<16x128xf32>
      tpu.vector_store %arg5[%c0_12, %c0_13], %20 {strides = array<i32>} : memref<16x128xf32, #tpu.memory_space<vmem>>, vector<16x128xf32>,
    } else {
    }
    return
  }
  func.func @transform_0(%arg0: i32, %arg1: i32, %arg2: i32) -> (i32, i32) {
    %c0_i32 = arith.constant 0 : i32
    %c0_i32_0 = arith.constant 0 : i32
    return %arg1, %c0_i32 : i32, i32
  }
  func.func @transform_1(%arg0: i32, %arg1: i32, %arg2: i32) -> (i32, i32) {
    %c0_i32 = arith.constant 0 : i32
    return %arg2, %arg0 : i32, i32
  }
  func.func @transform_2(%arg0: i32, %arg1: i32, %arg2: i32) -> (i32, i32) {
    %c0_i32 = arith.constant 0 : i32
    return %arg1, %arg0 : i32, i32
  }
}

</mosaic_0001>

<bundles_post_ra>
// kernel: embedding_gather.1
= control target key start
LH: loop header
LB: loop body
LE: loop exit
PB: predicated region body
PF: predicated region fallthrough
CT: control target
= control target key end

     0   :  { %v160_v0 = vmov 0   ;;  %v23_v6 = vlaneseq  ;;  %vm41_vm0 = vcmask 130048   ;;  %v161_v9 = vmov 0.0   ;;  %s195_s0 = inlined_call_operand.vmem [shape: s32[16,1], index: 0, kind: input, shape index: {}]   ;;  %s196_s1 = inlined_call_operand.vmem [shape: f32[16,128], index: 1, kind: input, shape index: {}]   ;;  %s197_s2 = inlined_call_operand.vmem [shape: f32[16,128], index: 2, kind: output, shape index: {}]  }
   0x1   :  { %159 = vset.pattern.permute.xlu0 %v160_v0  ;;  %v17_v1 = vld [vmem:[%s195_s0] sm:$0xff]  ;;  %v40_v3 = vld [vmem:[%s196_s1 + $0x8] sm:$0xff] }
   0x2   :  { %v39_v2 = vld [vmem:[%s196_s1] sm:$0xff]  ;;  %26 = vperm.xlu0 %159, %v17_v1   ;;  %v18_v4 = vld [vmem:[%s195_s0 + $0x8] sm:$0xff]  ;;  %v24_v7 = vand.u32 127, %v23_v6 }
   0x3   :  { %v153_v5 = vpack.c.bf16 %v40_v3, %v39_v2 }
   0x5   :  { %154 = vmatprep.subr.bf16.mxu0 %v153_v5 }
   0x6   :  { %29 = vperm.xlu0 %159, %v18_v4   ;;  %156 = vmatpush3.bf16.msra.mxu0 %v153_v5 }
  0x81   :  { %v27_v8 = vpop.permute.xlu0 %26 }
  0x82   :  { %vm31_vm1 = vcmp.eq.s32.totalorder %v24_v7, %v27_v8 }
  0x83   :  { %v138_v10 = vsel %vm31_vm1, 1.0, %v161_v9 }
  0x84   :  { %150 = vmatprep.mubr.msk.f32.mxu0 %vm41_vm0, %v138_v10 }
  0x85   :  { %v30_v11 = vpop.permute.xlu0 %29 }
  0x86   :  { %vm32_vm2 = vcmp.eq.s32.totalorder %v24_v7, %v30_v11 }
  0x87   :  { %v139_v12 = vsel %vm32_vm2, 1.0, %v161_v9 }
  0x88   :  { %151 = vmatmul.mubr.msk.f32.vlgmr.msra.gmra.mrb[0].mxu0 %vm41_vm0, %v139_v12 }
 0x15b   :  { %v152_v13 = vpop.f32.mrb[0].mxu0 }
 0x15c   :  { %133 = vst [vmem:[%s197_s2 + $0x8] sm:$0xff] %v152_v13  ;;  %v114_v14 = vpop.f32.mrb[1].mxu0 }
 0x15d   :  { %132 = vst [vmem:[%s197_s2] sm:$0xff] %v114_v14 }

</bundles_post_ra>
